<compile_context>
chip_gen: v6e
topology: v6e:2x2x1
jax: 0.10.0
libtpu: 0.0.40
codegen_flags: <defaults>
</compile_context>

<pallas_src>
import functools
import math

import jax
import jax.numpy as jnp
from jax import lax
from jax.experimental import pallas as pl
from jax.experimental.pallas import tpu as pltpu

LANE = 128
SUB = 8


def _cdiv(a, b):
    return -(-a // b)


def _round_up(a, m):
    return _cdiv(a, m) * m


def _round_down(a, m):
    return max(m, (a // m) * m)


def _si_sdr_jax(x, y, eps):
    """Pure-JAX mirror of the PyTorch forward (also the tiny-problem path)."""
    rss = jnp.sum(y * y, axis=-1, keepdims=True)
    a = (jnp.sum(y * x, axis=-1, keepdims=True) + eps) / (rss + eps)
    e_true = a * y
    e_res = x - e_true
    sss = jnp.sum(e_true * e_true, axis=-1)
    snn = jnp.sum(e_res * e_res, axis=-1)
    return 10.0 * jnp.log10((sss + eps) / (snn + eps))


def _si_sdr_kernel(x_ref, t_ref, o_ref, ss_acc, xy_acc, xx_acc, *,
                   eps, t_len, tile_t, acc_w, ragged_t):
    # x_ref/t_ref: (tile_b, tile_t) native-dtype tiles
    # o_ref:       (tile_b, 1) output block (resident across the time axis)
    # *_acc:       (tile_b, acc_w) f32 VMEM accumulators
    k = pl.program_id(1)

    @pl.when(k == 0)
    def _():
        ss_acc[...] = jnp.zeros_like(ss_acc)
        xy_acc[...] = jnp.zeros_like(xy_acc)
        xx_acc[...] = jnp.zeros_like(xx_acc)

    base = k * tile_t
    # Element-wise (VALU-only) fold of lane-aligned chunks into the
    # accumulators.  Chunked ref loads keep vreg pressure low regardless of
    # tile size; the static Python loop fully unrolls.
    for j in range(tile_t // acc_w):
        sl = slice(j * acc_w, (j + 1) * acc_w)
        xs = x_ref[:, sl].astype(jnp.float32)
        ts = t_ref[:, sl].astype(jnp.float32)
        if ragged_t:
            # Mask the out-of-bounds tail of the last time tile (garbage data).
            col = base + j * acc_w + lax.broadcasted_iota(jnp.int32, xs.shape, 1)
            valid = col < t_len
            xs = jnp.where(valid, xs, 0.0)
            ts = jnp.where(valid, ts, 0.0)
        ss_acc[:, sl] += ts * ts
        xy_acc[:, sl] += xs * ts
        xx_acc[:, sl] += xs * xs

    @pl.when(k == pl.num_programs(1) - 1)
    def _():
        rss = jnp.sum(ss_acc[...], axis=-1, keepdims=True)   # Σ target²
        rxy = jnp.sum(xy_acc[...], axis=-1, keepdims=True)   # Σ target·input
        rxx = jnp.sum(xx_acc[...], axis=-1, keepdims=True)   # Σ input²
        a = (rxy + eps) / (rss + eps)
        sss = a * a * rss
        # Σ(input - a·target)²; clamp tiny negative values from cancellation.
        snn = jnp.maximum(rxx - 2.0 * a * rxy + a * a * rss, 0.0)
        sdr = jnp.log((sss + eps) / (snn + eps)) * jnp.float32(10.0 / math.log(10.0))
        o_ref[...] = sdr.astype(o_ref.dtype)


def si_sdr(inp, target, *, tile_t=None, target_tile_bytes=2 * 1024 * 1024,
           use_kernel=None):
    """Pallas equivalent of SiSdr.forward.

    inp, target: same shape, last dim = time.  Returns shape (prod(leading),).
    """
    assert inp.shape == target.shape, (inp.shape, target.shape)
    t_len = inp.shape[-1]
    x = inp.reshape(-1, t_len)
    y = target.reshape(-1, t_len)
    b = x.shape[0]
    eps = float(jnp.finfo(inp.dtype).eps)

    if use_kernel is None:
        # Tiny problems: kernel launch + grid overhead dwarfs the work.
        use_kernel = (x.size * x.dtype.itemsize) >= (1 << 20)
    if not use_kernel:
        return _si_sdr_jax(x, y, eps)

    itemsize = x.dtype.itemsize
    t_ceil = _round_up(t_len, LANE)

    # Lane (time) tile: ~target_tile_bytes per input per grid step.
    if tile_t is None:
        tile_t = target_tile_bytes // (SUB * itemsize)
    tile_t = min(_round_down(int(tile_t), LANE), t_ceil)

    # Row tile: grow past 8 only when the whole (padded) time axis fits one tile.
    tile_b = SUB
    if tile_t == t_ceil:
        cap = _round_down(target_tile_bytes // max(1, tile_t * itemsize), SUB)
        tile_b = max(SUB, min(_round_up(b, SUB), cap))

    pad_b = (-b) % tile_b
    if pad_b:  # zero rows -> SDR 0; sliced off below
        x = jnp.pad(x, ((0, pad_b), (0, 0)))
        y = jnp.pad(y, ((0, pad_b), (0, 0)))
    bp = b + pad_b

    n_b = bp // tile_b
    n_t = _cdiv(t_len, tile_t)
    ragged_t = (n_t * tile_t != t_len)

    # Accumulator lane width: wide enough to keep the fold element-wise, small
    # enough (<= ~4 MiB total) to not eat the VMEM budget for big row tiles.
    acc_cap = max(LANE, _round_down((4 << 20) // (3 * tile_b * 4), LANE))
    acc_w = LANE
    for cand in (1024, 512, 256, 128):
        if cand <= min(tile_t, acc_cap) and tile_t % cand == 0:
            acc_w = cand
            break

    # VMEM budget: 2 inputs x 2 pipeline buffers x tile + accumulators + output.
    vmem_need = (2 * 2 * tile_b * tile_t * itemsize
                 + 3 * tile_b * acc_w * 4
                 + 2 * tile_b * 4)
    vmem_limit = int(min(max(2 * vmem_need, 32 * 1024 * 1024), 64 * 1024 * 1024))

    kernel = functools.partial(
        _si_sdr_kernel, eps=eps, t_len=t_len, tile_t=tile_t, acc_w=acc_w,
        ragged_t=ragged_t)

    out = pl.pallas_call(
        kernel,
        out_shape=jax.ShapeDtypeStruct((bp, 1), inp.dtype),
        grid_spec=pltpu.PrefetchScalarGridSpec(
            num_scalar_prefetch=0,
            grid=(n_b, n_t),
            in_specs=[
                pl.BlockSpec((tile_b, tile_t), lambda i, k: (i, k)),
                pl.BlockSpec((tile_b, tile_t), lambda i, k: (i, k)),
            ],
            out_specs=pl.BlockSpec((tile_b, 1), lambda i, k: (i, 0)),
            scratch_shapes=[
                pltpu.VMEM((tile_b, acc_w), jnp.float32),
                pltpu.VMEM((tile_b, acc_w), jnp.float32),
                pltpu.VMEM((tile_b, acc_w), jnp.float32),
            ],
        ),
        compiler_params=pltpu.CompilerParams(
            dimension_semantics=("parallel", "arbitrary"),
            vmem_limit_bytes=vmem_limit,
        ),
    )(x, y)
    # TODO(synk): on v7x, rows already shard across the 2 TensorCores via the
    # "parallel" row axis; a time-axis core split would only help when n_b == 1.
    return out[:b, 0]


if __name__ == "__main__":
    key = jax.random.PRNGKey(0)
    k1, k2 = jax.random.split(key)

    batch, ch, t = 2, 4, 400          # -> reshaped to (8, 400); T not /128
    target = jax.random.normal(k1, (batch, ch, t), dtype=jnp.float32)
    noise = jax.random.normal(k2, (batch, ch, t), dtype=jnp.float32)
    inp = 0.8 * target + 0.3 * noise  # realistic mixture -> finite SDR values

    out = si_sdr(inp, target, use_kernel=True)   # force kernel path for demo
    out = jax.block_until_ready(out)

    eps = float(jnp.finfo(inp.dtype).eps)
    ref = _si_sdr_jax(inp.reshape(-1, t), target.reshape(-1, t), eps)

    assert out.shape == (batch * ch,), out.shape
    assert jnp.allclose(out, ref, rtol=1e-4, atol=1e-3), (out, ref)
    print("KERNEL_OK")
</pallas_src>

<mosaic_0001>
module attributes {stable_mosaic.version = 11 : i64} {
  func.func @_si_sdr_kernel(%arg0: i32, %arg1: i32, %arg2: memref<8x512xf32, #tpu.memory_space<vmem>>, %arg3: memref<8x512xf32, #tpu.memory_space<vmem>>, %arg4: memref<8x1xf32, #tpu.memory_space<vmem>>, %arg5: memref<8x512xf32, #tpu.memory_space<vmem>>, %arg6: memref<8x512xf32, #tpu.memory_space<vmem>>, %arg7: memref<8x512xf32, #tpu.memory_space<vmem>>) attributes {dimension_semantics = [#tpu.dimension_semantics<parallel>, #tpu.dimension_semantics<arbitrary>], iteration_bounds = array<i64: 1, 1>, scalar_prefetch = 0 : i64, scratch_operands = 3 : i64, tpu.core_type = #tpu.core_type<tc>, window_params = [{transform_indices = @transform_0, window_bounds = array<i64: 8, 512>}, {transform_indices = @transform_1, window_bounds = array<i64: 8, 512>}, {transform_indices = @transform_2, window_bounds = array<i64: 8, 1>}]} {
    %c0_i32 = arith.constant 0 : i32
    %0 = arith.cmpi eq, %arg1, %c0_i32 : i32
    %1 = arith.extui %0 : i1 to i32
    %c0_i32_0 = arith.constant 0 : i32
    %2 = arith.cmpi ne, %1, %c0_i32_0 : i32
    scf.if %2 {
      %cst_20 = arith.constant 0.000000e+00 : f32
      %31 = vector.broadcast %cst_20 : f32 to vector<8x512xf32>
      %c0_21 = arith.constant 0 : index
      %c0_22 = arith.constant 0 : index
      %32 = vector.load %arg5[%c0_21, %c0_22] : memref<8x512xf32, #tpu.memory_space<vmem>>, vector<8x512xf32>
      tpu.vector_store %arg5[%c0_21, %c0_22], %31 {strides = array<i32>} : memref<8x512xf32, #tpu.memory_space<vmem>>, vector<8x512xf32>,
      %cst_23 = arith.constant 0.000000e+00 : f32
      %33 = vector.broadcast %cst_23 : f32 to vector<8x512xf32>
      %c0_24 = arith.constant 0 : index
      %c0_25 = arith.constant 0 : index
      %34 = vector.load %arg6[%c0_24, %c0_25] : memref<8x512xf32, #tpu.memory_space<vmem>>, vector<8x512xf32>
      tpu.vector_store %arg6[%c0_24, %c0_25], %33 {strides = array<i32>} : memref<8x512xf32, #tpu.memory_space<vmem>>, vector<8x512xf32>,
      %cst_26 = arith.constant 0.000000e+00 : f32
      %35 = vector.broadcast %cst_26 : f32 to vector<8x512xf32>
      %c0_27 = arith.constant 0 : index
      %c0_28 = arith.constant 0 : index
      %36 = vector.load %arg7[%c0_27, %c0_28] : memref<8x512xf32, #tpu.memory_space<vmem>>, vector<8x512xf32>
      tpu.vector_store %arg7[%c0_27, %c0_28], %35 {strides = array<i32>} : memref<8x512xf32, #tpu.memory_space<vmem>>, vector<8x512xf32>,
    } else {
    }
    %c512_i32 = arith.constant 512 : i32
    %3 = arith.muli %arg1, %c512_i32 : i32
    %c0 = arith.constant 0 : index
    %c0_1 = arith.constant 0 : index
    %4 = vector.load %arg2[%c0, %c0_1] : memref<8x512xf32, #tpu.memory_space<vmem>>, vector<8x512xf32>
    %c0_2 = arith.constant 0 : index
    %c0_3 = arith.constant 0 : index
    %5 = vector.load %arg3[%c0_2, %c0_3] : memref<8x512xf32, #tpu.memory_space<vmem>>, vector<8x512xf32>
    %c0_i32_4 = arith.constant 0 : i32
    %6 = arith.addi %3, %c0_i32_4 : i32
    %7 = tpu.iota {dimensions = array<i32: 1>} : vector<8x512xi32>
    %8 = vector.broadcast %6 : i32 to vector<8x512xi32>
    %9 = arith.addi %8, %7 : vector<8x512xi32>
    %c400_i32 = arith.constant 400 : i32
    %10 = vector.broadcast %c400_i32 : i32 to vector<8x512xi32>
    %11 = arith.cmpi slt, %9, %10 : vector<8x512xi32>
    %cst = arith.constant 0.000000e+00 : f32
    %12 = vector.broadcast %cst : f32 to vector<8x512xf32>
    %13 = arith.select %11, %4, %12 : vector<8x512xi1>, vector<8x512xf32>
    %cst_5 = arith.constant 0.000000e+00 : f32
    %14 = vector.broadcast %cst_5 : f32 to vector<8x512xf32>
    %15 = arith.select %11, %5, %14 : vector<8x512xi1>, vector<8x512xf32>
    %c0_6 = arith.constant 0 : index
    %c0_7 = arith.constant 0 : index
    %16 = vector.load %arg5[%c0_6, %c0_7] : memref<8x512xf32, #tpu.memory_space<vmem>>, vector<8x512xf32>
    %17 = arith.mulf %15, %15 : vector<8x512xf32>
    %18 = arith.addf %16, %17 : vector<8x512xf32>
    %c0_8 = arith.constant 0 : index
    %c0_9 = arith.constant 0 : index
    %19 = vector.load %arg5[%c0_8, %c0_9] : memref<8x512xf32, #tpu.memory_space<vmem>>, vector<8x512xf32>
    tpu.vector_store %arg5[%c0_8, %c0_9], %18 {strides = array<i32>} : memref<8x512xf32, #tpu.memory_space<vmem>>, vector<8x512xf32>,
    %c0_10 = arith.constant 0 : index
    %c0_11 = arith.constant 0 : index
    %20 = vector.load %arg6[%c0_10, %c0_11] : memref<8x512xf32, #tpu.memory_space<vmem>>, vector<8x512xf32>
    %21 = arith.mulf %13, %15 : vector<8x512xf32>
    %22 = arith.addf %20, %21 : vector<8x512xf32>
    %c0_12 = arith.constant 0 : index
    %c0_13 = arith.constant 0 : index
    %23 = vector.load %arg6[%c0_12, %c0_13] : memref<8x512xf32, #tpu.memory_space<vmem>>, vector<8x512xf32>
    tpu.vector_store %arg6[%c0_12, %c0_13], %22 {strides = array<i32>} : memref<8x512xf32, #tpu.memory_space<vmem>>, vector<8x512xf32>,
    %c0_14 = arith.constant 0 : index
    %c0_15 = arith.constant 0 : index
    %24 = vector.load %arg7[%c0_14, %c0_15] : memref<8x512xf32, #tpu.memory_space<vmem>>, vector<8x512xf32>
    %25 = arith.mulf %13, %13 : vector<8x512xf32>
    %26 = arith.addf %24, %25 : vector<8x512xf32>
    %c0_16 = arith.constant 0 : index
    %c0_17 = arith.constant 0 : index
    %27 = vector.load %arg7[%c0_16, %c0_17] : memref<8x512xf32, #tpu.memory_space<vmem>>, vector<8x512xf32>
    tpu.vector_store %arg7[%c0_16, %c0_17], %26 {strides = array<i32>} : memref<8x512xf32, #tpu.memory_space<vmem>>, vector<8x512xf32>,
    %c0_i32_18 = arith.constant 0 : i32
    %28 = arith.cmpi eq, %arg1, %c0_i32_18 : i32
    %29 = arith.extui %28 : i1 to i32
    %c0_i32_19 = arith.constant 0 : i32
    %30 = arith.cmpi ne, %29, %c0_i32_19 : i32
    scf.if %30 {
      %c0_20 = arith.constant 0 : index
      %c0_21 = arith.constant 0 : index
      %31 = vector.load %arg5[%c0_20, %c0_21] : memref<8x512xf32, #tpu.memory_space<vmem>>, vector<8x512xf32>
      %cst_22 = arith.constant dense<0.000000e+00> : vector<8xf32>
      %32 = vector.multi_reduction <add>, %31, %cst_22 [1] : vector<8x512xf32> to vector<8xf32>
      %33 = vector.shape_cast %32 : vector<8xf32> to vector<8x1xf32>
      %c0_23 = arith.constant 0 : index
      %c0_24 = arith.constant 0 : index
      %34 = vector.load %arg6[%c0_23, %c0_24] : memref<8x512xf32, #tpu.memory_space<vmem>>, vector<8x512xf32>
      %cst_25 = arith.constant dense<0.000000e+00> : vector<8xf32>
      %35 = vector.multi_reduction <add>, %34, %cst_25 [1] : vector<8x512xf32> to vector<8xf32>
      %36 = vector.shape_cast %35 : vector<8xf32> to vector<8x1xf32>
      %c0_26 = arith.constant 0 : index
      %c0_27 = arith.constant 0 : index
      %37 = vector.load %arg7[%c0_26, %c0_27] : memref<8x512xf32, #tpu.memory_space<vmem>>, vector<8x512xf32>
      %cst_28 = arith.constant dense<0.000000e+00> : vector<8xf32>
      %38 = vector.multi_reduction <add>, %37, %cst_28 [1] : vector<8x512xf32> to vector<8xf32>
      %39 = vector.shape_cast %38 : vector<8xf32> to vector<8x1xf32>
      %cst_29 = arith.constant 1.1920929E-7 : f32
      %40 = vector.broadcast %cst_29 : f32 to vector<8x1xf32>
      %41 = arith.addf %36, %40 : vector<8x1xf32>
      %cst_30 = arith.constant 1.1920929E-7 : f32
      %42 = vector.broadcast %cst_30 : f32 to vector<8x1xf32>
      %43 = arith.addf %33, %42 : vector<8x1xf32>
      %44 = arith.divf %41, %43 : vector<8x1xf32>
      %45 = arith.mulf %44, %44 : vector<8x1xf32>
      %46 = arith.mulf %45, %33 : vector<8x1xf32>
      %cst_31 = arith.constant 2.000000e+00 : f32
      %47 = vector.broadcast %cst_31 : f32 to vector<8x1xf32>
      %48 = arith.mulf %47, %44 : vector<8x1xf32>
      %49 = arith.mulf %48, %36 : vector<8x1xf32>
      %50 = arith.subf %39, %49 : vector<8x1xf32>
      %51 = arith.mulf %44, %44 : vector<8x1xf32>
      %52 = arith.mulf %51, %33 : vector<8x1xf32>
      %53 = arith.addf %50, %52 : vector<8x1xf32>
      %cst_32 = arith.constant 0.000000e+00 : f32
      %54 = vector.broadcast %cst_32 : f32 to vector<8x1xf32>
      %55 = arith.maximumf %53, %54 : vector<8x1xf32>
      %cst_33 = arith.constant 1.1920929E-7 : f32
      %56 = vector.broadcast %cst_33 : f32 to vector<8x1xf32>
      %57 = arith.addf %46, %56 : vector<8x1xf32>
      %cst_34 = arith.constant 1.1920929E-7 : f32
      %58 = vector.broadcast %cst_34 : f32 to vector<8x1xf32>
      %59 = arith.addf %55, %58 : vector<8x1xf32>
      %60 = arith.divf %57, %59 : vector<8x1xf32>
      %61 = math.log %60 : vector<8x1xf32>
      %cst_35 = arith.constant 4.34294462 : f32
      %62 = vector.broadcast %cst_35 : f32 to vector<8x1xf32>
      %63 = arith.mulf %61, %62 : vector<8x1xf32>
      %c0_36 = arith.constant 0 : index
      %c0_37 = arith.constant 0 : index
      %64 = vector.load %arg4[%c0_36, %c0_37] : memref<8x1xf32, #tpu.memory_space<vmem>>, vector<8x1xf32>
      tpu.vector_store %arg4[%c0_36, %c0_37], %63 {strides = array<i32>} : memref<8x1xf32, #tpu.memory_space<vmem>>, vector<8x1xf32>,
    } else {
    }
    return
  }
  func.func @transform_0(%arg0: i32, %arg1: i32) -> (i32, i32) {
    %c0_i32 = arith.constant 0 : i32
    return %arg0, %arg1 : i32, i32
  }
  func.func @transform_1(%arg0: i32, %arg1: i32) -> (i32, i32) {
    %c0_i32 = arith.constant 0 : i32
    return %arg0, %arg1 : i32, i32
  }
  func.func @transform_2(%arg0: i32, %arg1: i32) -> (i32, i32) {
    %c0_i32 = arith.constant 0 : i32
    %c0_i32_0 = arith.constant 0 : i32
    return %arg0, %c0_i32 : i32, i32
  }
}

</mosaic_0001>

<bundles_post_ra>
// kernel: tpu_custom_call.1
= control target key start
LH: loop header
LB: loop body
LE: loop exit
PB: predicated region body
PF: predicated region fallthrough
CT: control target
= control target key end

     0   :  { %7 = vsyncpa [#allocation6], 0  ;;  %s266_s0 = inlined_call_operand.hbm [shape: f32[8,400], index: 0, kind: input, shape index: {}]   ;;  %s267_s1 = inlined_call_operand.hbm [shape: f32[8,400], index: 1, kind: input, shape index: {}]   ;;  %s268_s2 = inlined_call_operand.vmem [shape: f32[8,1], index: 2, kind: output, shape index: {}]  }
   0x1   :  { %8 = vsyncpa [#allocation8], 0  ;;  %s238_s9 = smov [#allocation5]   ;;  %s239_s11 = smov [#allocation7]  }
   0x2   :  { %s15_s10 = sshll.u32 %s238_s9, 4  ;;  %s25_s12 = sshll.u32 %s239_s11, 4  ;;  %s16_s10 = int_to_ptr.vmem [resolvable:$true] %s15_s10  ;;  %s26_s12 = int_to_ptr.vmem [resolvable:$true] %s25_s12 }
   0x3   :  { %s202_s13 = scalar_lea.vmem %s16_s10, 512  ;;  %p207_p1 = scmp.lt.s32.totalorder %s16_s10, %s16_s10 }
   0x4   :  { %p203_p0 = scmp.ne.s32.totalorder %s16_s10, %s202_s13  ;;  %p208_p2 = scmp.lt.s32.totalorder %s202_s13, %s202_s13 }
   0x6   :  { %p209_p3 = por %p208_p2, %p207_p1 }
   0x8   :  { %p210_p4 = pnand %p209_p3, %p203_p0 }
   0xa   :  { %213 = shalt.err (!%p210_p4)
}
   0xb   :  { %18 = dma.hbm_to_vmem [thread:$0]  %s266_s0, 512, %s16_s10, [#allocation6]  }
   0xc   :  { %s222_s16 = scalar_lea.vmem %s26_s12, 512  ;;  %p227_p6 = scmp.lt.s32.totalorder %s26_s12, %s26_s12 }
   0xd   :  { %p223_p5 = scmp.ne.s32.totalorder %s26_s12, %s222_s16  ;;  %p228_p7 = scmp.lt.s32.totalorder %s222_s16, %s222_s16 }
   0xf   :  { %p229_p8 = por %p228_p7, %p227_p6 }
  0x11   :  { %p230_p9 = pnand %p229_p8, %p223_p5 }
  0x13   :  { %233 = shalt.err (!%p230_p9)
}
  0x14   :  { %28 = dma.hbm_to_vmem [thread:$0]  %s267_s1, 512, %s26_s12, [#allocation8]  }
  0x15   :  { %234 = dma.done.wait [#allocation6], 512  }
  0x16   :  { %235 = vsyncadd [#allocation6], 4294966784 }
  0x17   :  { %236 = dma.done.wait [#allocation8], 512  }
  0x18   :  { %237 = vsyncadd [#allocation8], 4294966784  ;;  %v60_v0 = vlaneseq  ;;  %v56_v3 = vld [vmem:[#allocation7] sm:$0xff]  ;;  %v57_v4 = vld [vmem:[#allocation7 + $0x8] sm:$0xff]  ;;  %vm178_vm1 = vcmask 7168  }
  0x19   :  { %v58_v5 = vld [vmem:[#allocation7 + $0x10] sm:$0xff]  ;;  %v59_v6 = vld [vmem:[#allocation7 + $0x18] sm:$0xff]  ;;  %v86_v7 = vmul.f32 %v56_v3, %v56_v3  ;;  %v87_v8 = vmul.f32 %v57_v4, %v57_v4  ;;  %v52_v10 = vld [vmem:[#allocation5] sm:$0xff] }
  0x1a   :  { %v61_v1 = vand.u32 127, %v60_v0  ;;  %v88_v9 = vmul.f32 %v58_v5, %v58_v5  ;;  %v53_v11 = vld [vmem:[#allocation5 + $0x8] sm:$0xff]  ;;  %v54_v13 = vld [vmem:[#allocation5 + $0x10] sm:$0xff]  ;;  %v55_v14 = vld [vmem:[#allocation5 + $0x18] sm:$0xff]  ;;  %v102_v15 = vmul.f32 %v56_v3, %v52_v10  ;;  %v118_v17 = vmul.f32 %v52_v10, %v52_v10 }
  0x1b   :  { %v103_v16 = vmul.f32 %v57_v4, %v53_v11  ;;  %v137_v19 = vadd.f32 %v87_v8, %v86_v7  ;;  %v104_v21 = vmul.f32 %v58_v5, %v54_v13  ;;  %v119_v23 = vmul.f32 %v53_v11, %v53_v11 }
  0x1c   :  { %v64_v2 = vadd.s32 384, %v61_v1  ;;  %v120_v24 = vmul.f32 %v54_v13, %v54_v13 }
  0x1d   :  { %v146_v22 = vadd.f32 %v103_v16, %v102_v15  ;;  %v138_v25 = vadd.f32 %v137_v19, %v88_v9  ;;  %v155_v29 = vadd.f32 %v119_v23, %v118_v17 }
  0x1e   :  { %vm73_vm0 = vcmp.lt.s32.totalorder %v64_v2, 400 }
  0x1f   :  { %v81_v12 = vsel %vm73_vm0, %v59_v6, 0.0  ;;  %v77_v20 = vsel %vm73_vm0, %v55_v14, 0.0  ;;  %v147_v27 = vadd.f32 %v146_v22, %v104_v21  ;;  %v156_v31 = vadd.f32 %v155_v29, %v120_v24 }
  0x20   :  { %v89_v18 = vmul.f32 %v81_v12, %v81_v12  ;;  %v105_v26 = vmul.f32 %v81_v12, %v77_v20  ;;  %v121_v28 = vmul.f32 %v77_v20, %v77_v20 }
  0x22   :  { %v139_v30 = vadd.f32 %v138_v25, %v89_v18  ;;  %v148_v32 = vadd.f32 %v147_v27, %v105_v26  ;;  %v157_v33 = vadd.f32 %v156_v31, %v121_v28 }
  0x24   :  { %140 = vadd.xlane.f32.xlu0 %v139_v30  ;;  %158 = vadd.xlane.f32.xlu1 %v157_v33 }
  0x28   :  { %149 = vadd.xlane.f32.xlu0 %v148_v32 }
  0xad   :  { %v141_v34 = vpop.xlane.xlu0 %140  ;;  %v159_v42 = vpop.xlane.xlu1 %158 }
  0xae   :  { %v161_v35 = vadd.f32 1.1920929e-07, %v141_v34 }
  0xb0   :  { %188 = vrcp.f32 %v161_v35 }
  0xb1   :  { %v150_v36 = vpop.xlane.xlu0 %149 }
  0xb2   :  { %v160_v37 = vadd.f32 1.1920929e-07, %v150_v36 }
  0xbd   :  { %v189_v38 = vpop.eup %188 }
  0xbe   :  { %v163_v39 = vmul.f32 %v189_v38, %v160_v37 }
  0xc0   :  { %v164_v40 = vmul.f32 %v163_v39, %v163_v39  ;;  %v166_v41 = vmul.f32 2.0, %v163_v39 }
  0xc2   :  { %v167_v43 = vmul.f32 %v166_v41, %v150_v36  ;;  %v165_v44 = vmul.f32 %v164_v40, %v141_v34 }
  0xc4   :  { %v168_v45 = vsub.f32 %v159_v42, %v167_v43  ;;  %v171_v49 = vadd.f32 1.1920929e-07, %v165_v44 }
  0xc6   :  { %v169_v46 = vadd.f32 %v168_v45, %v165_v44 }
  0xc8   :  { %v170_v47 = vmax.f32 %v169_v46, 0.0 }
  0xca   :  { %v172_v48 = vadd.f32 1.1920929e-07, %v170_v47 }
  0xcc   :  { %190 = vrcp.f32 %v172_v48 }
  0xd9   :  { %v191_v50 = vpop.eup %190 }
  0xda   :  { %v174_v51 = vmul.f32 %v191_v50, %v171_v49 }
  0xdc   :  { %192 = vlog2.f32 %v174_v51 }
  0xe9   :  { %v193_v52 = vpop.eup %192 }
  0xea   :  { %v176_v53 = vmul.f32 0.6931472, %v193_v52 }
  0xec   :  { %v177_v54 = vmul.f32 4.3429446, %v176_v53 }
  0xee   :  { %179 = vst.msk [vmem:[%s268_s2] sm:$0xff] %vm178_vm1, %v177_v54 }
  0xef   :  { %184 = vsyncpa [#allocation6], 1 }
  0xf0   :  { %185 = vsyncpa [#allocation8], 1 }

</bundles_post_ra>
